<compile_context>
chip_gen: v7x
topology: tpu7x:2x2x1
jax: 0.10.0
libtpu: 0.0.40
codegen_flags: <defaults>
</compile_context>

<pallas_src>
import math

import jax
import jax.numpy as jnp
from jax.experimental import pallas as pl
from jax.experimental.pallas import tpu as pltpu

# ---------------- config (matches module __init__) ----------------
NUM_MIX = 5
HIDDEN_SIZES = [32, 32]
NOUT = NUM_MIX * 3          # 15
NOUT_PAD = 128              # lane-dense padded output width (unmasked stores)
BATCH = 8


def _round_up(n, m):
    return ((n + m - 1) // m) * m


# ---------------- Pallas kernel (net2 only) ----------------
def flow_net2_kernel(
    x1_ref,    # (TB, 1)          f32   -- x[:, 0:1] row tile
    w0_ref,    # (1, H0)          f32   -- Linear(1, H0) weight^T
    b0_ref,    # (1, H0)          f32
    w1_ref,    # (H0, H1)         f32   -- Linear(H0, H1) weight^T
    b1_ref,    # (1, H1)          f32
    w2_ref,    # (H1, NOUT_PAD)   f32   -- Linear(H1, NOUT) weight^T, zero-padded to 128 lanes
    b2_ref,    # (1, NOUT_PAD)    f32   -- bias, zero-padded to 128 lanes
    out_ref,   # (TB, NOUT_PAD)   f32   -- x2_logits (padded)
):
    x1 = x1_ref[...]                                         # (TB, 1)

    # Layer 0 has K=1: outer product via VPU broadcast instead of an MXU matmul.
    h = jax.nn.sigmoid(x1 * w0_ref[...] + b0_ref[...])       # (TB, H0)

    h = jax.nn.sigmoid(
        jnp.dot(h, w1_ref[...], preferred_element_type=jnp.float32) + b1_ref[...]
    )                                                        # (TB, H1)

    # Final layer writes a 128-lane-wide slab -> single unmasked full-width store.
    out_ref[...] = (
        jnp.dot(h, w2_ref[...], preferred_element_type=jnp.float32) + b2_ref[...]
    )                                                        # (TB, NOUT_PAD)


# ---------------- wrapper ----------------
def flow_forward(x, params, *, batch_tile=256):
    """x: (B, 2) -> logits (B, 3, num_mix, 2), matching the PyTorch forward."""
    B = x.shape[0]
    x = x.astype(jnp.float32)
    x1 = x[:, 0:1]                                           # (B, 1)

    # Batch tiling: row tile is a multiple of 8 (sublane), capped at `batch_tile`.
    tb = min(batch_tile, _round_up(B, 8))
    bp = _round_up(B, tb)
    if bp != B:
        x1 = jnp.pad(x1, ((0, bp - B), (0, 0)))
    grid = (bp // tb,)

    h0, h1 = HIDDEN_SIZES

    # Zero-pad the last linear layer to 128 output lanes so the kernel store is lane-dense.
    w2p = jnp.pad(params["w2"], ((0, 0), (0, NOUT_PAD - NOUT)))
    b2p = jnp.pad(params["b2"], ((0, 0), (0, NOUT_PAD - NOUT)))

    def full(shape):  # full (non-blocked) operand, same block for every grid step
        return pl.BlockSpec(shape, lambda i: (0, 0))

    out2_pad = pl.pallas_call(
        flow_net2_kernel,
        out_shape=jax.ShapeDtypeStruct((bp, NOUT_PAD), jnp.float32),
        grid=grid,
        in_specs=[
            pl.BlockSpec((tb, 1), lambda i: (i, 0)),         # x1 row tile
            full((1, h0)), full((1, h0)),                    # w0, b0
            full((h0, h1)), full((1, h1)),                   # w1, b1
            full((h1, NOUT_PAD)), full((1, NOUT_PAD)),       # w2 (padded), b2 (padded)
        ],
        out_specs=pl.BlockSpec((tb, NOUT_PAD), lambda i: (i, 0)),
        compiler_params=pltpu.CompilerParams(
            dimension_semantics=("parallel",),               # shards batch over v7x's 2 TCs
        ),
    )(x1, params["w0"], params["b0"], params["w1"], params["b1"], w2p, b2p)

    x2_logits = out2_pad[:B, :NOUT]                          # drop batch + lane padding

    # net1(zeros(B,1)) is exactly the bias broadcast: zero FLOPs, done in the wrapper.
    x1_logits = jnp.broadcast_to(params["n1b"], (B, NOUT))

    # Module contract requires the trailing size-2 stack axis -> (B, 3, num_mix, 2).
    # (Consumers wanting a lane-dense layout should use the (B, NOUT) slabs above.)
    logits = jnp.stack(
        [x1_logits.reshape(B, 3, NUM_MIX), x2_logits.reshape(B, 3, NUM_MIX)], axis=-1
    )
    return logits


# ---------------- deterministic parameter init ----------------
def init_params(key):
    """PyTorch-Linear-style uniform(-1/sqrt(fan_in), 1/sqrt(fan_in)) init, deterministic."""
    def linear(key, fan_in, fan_out):
        kw, kb = jax.random.split(key)
        bound = 1.0 / math.sqrt(fan_in)
        w = jax.random.uniform(kw, (fan_in, fan_out), jnp.float32, -bound, bound)  # stored W^T
        b = jax.random.uniform(kb, (1, fan_out), jnp.float32, -bound, bound)
        return w, b

    k_n1, k0, k1, k2 = jax.random.split(key, 4)
    h0, h1 = HIDDEN_SIZES
    n1w, n1b = linear(k_n1, 1, NOUT)       # net1: Linear(1, nout)  (weight unused in forward)
    w0, b0 = linear(k0, 1, h0)             # net2: Linear(1, h0)
    w1, b1 = linear(k1, h0, h1)            # net2: Linear(h0, h1)
    w2, b2 = linear(k2, h1, NOUT)          # net2: Linear(h1, nout)
    return {
        "n1w": n1w, "n1b": n1b,
        "w0": w0, "b0": b0,
        "w1": w1, "b1": b1,
        "w2": w2, "b2": b2,
    }


# pure-JAX reference for sanity check (same math, no Pallas)
def flow_forward_ref(x, p):
    B = x.shape[0]
    x = x.astype(jnp.float32)
    x1 = x[:, 0:1]
    x1_logits = jnp.zeros((B, 1)) @ p["n1w"] + p["n1b"]
    h = jax.nn.sigmoid(x1 @ p["w0"] + p["b0"])
    h = jax.nn.sigmoid(h @ p["w1"] + p["b1"])
    x2_logits = h @ p["w2"] + p["b2"]
    return jnp.stack(
        [x1_logits.reshape(B, 3, NUM_MIX), x2_logits.reshape(B, 3, NUM_MIX)], axis=-1
    )


if __name__ == "__main__":
    key = jax.random.PRNGKey(0)
    k_param, k_x = jax.random.split(key)

    params = init_params(k_param)
    x = jax.random.normal(k_x, (BATCH, 2), jnp.float32)   # (B, 2) input

    logits = jax.block_until_ready(flow_forward(x, params))

    ref = flow_forward_ref(x, params)
    assert logits.shape == (BATCH, 3, NUM_MIX, 2), logits.shape
    assert jnp.allclose(logits, ref, atol=1e-5, rtol=1e-5), "mismatch vs JAX reference"

    print("KERNEL_OK")
</pallas_src>

<mosaic_0001>
module attributes {stable_mosaic.version = 11 : i64} {
  func.func @flow_net2_kernel(%arg0: i32, %arg1: memref<8x1xf32, #tpu.memory_space<vmem>>, %arg2: memref<1x32xf32, #tpu.memory_space<vmem>>, %arg3: memref<1x32xf32, #tpu.memory_space<vmem>>, %arg4: memref<32x32xf32, #tpu.memory_space<vmem>>, %arg5: memref<1x32xf32, #tpu.memory_space<vmem>>, %arg6: memref<32x128xf32, #tpu.memory_space<vmem>>, %arg7: memref<1x128xf32, #tpu.memory_space<vmem>>, %arg8: memref<8x128xf32, #tpu.memory_space<vmem>>) attributes {dimension_semantics = [#tpu.dimension_semantics<parallel>], iteration_bounds = array<i64: 1>, scalar_prefetch = 0 : i64, scratch_operands = 0 : i64, tpu.core_type = #tpu.core_type<tc>, window_params = [{transform_indices = @transform_0, window_bounds = array<i64: 8, 1>}, {pipeline_mode = #tpu.pipeline_mode<synchronous>, transform_indices = @transform_1, window_bounds = array<i64: 1, 32>}, {pipeline_mode = #tpu.pipeline_mode<synchronous>, transform_indices = @transform_2, window_bounds = array<i64: 1, 32>}, {pipeline_mode = #tpu.pipeline_mode<synchronous>, transform_indices = @transform_3, window_bounds = array<i64: 32, 32>}, {pipeline_mode = #tpu.pipeline_mode<synchronous>, transform_indices = @transform_4, window_bounds = array<i64: 1, 32>}, {pipeline_mode = #tpu.pipeline_mode<synchronous>, transform_indices = @transform_5, window_bounds = array<i64: 32, 128>}, {pipeline_mode = #tpu.pipeline_mode<synchronous>, transform_indices = @transform_6, window_bounds = array<i64: 1, 128>}, {transform_indices = @transform_7, window_bounds = array<i64: 8, 128>}]} {
    %c0 = arith.constant 0 : index
    %c0_0 = arith.constant 0 : index
    %0 = vector.load %arg1[%c0, %c0_0] : memref<8x1xf32, #tpu.memory_space<vmem>>, vector<8x1xf32>
    %c0_1 = arith.constant 0 : index
    %c0_2 = arith.constant 0 : index
    %1 = vector.load %arg2[%c0_1, %c0_2] : memref<1x32xf32, #tpu.memory_space<vmem>>, vector<1x32xf32>
    %2 = vector.broadcast %0 : vector<8x1xf32> to vector<8x32xf32>
    %3 = vector.broadcast %1 : vector<1x32xf32> to vector<8x32xf32>
    %4 = arith.mulf %2, %3 : vector<8x32xf32>
    %c0_3 = arith.constant 0 : index
    %c0_4 = arith.constant 0 : index
    %5 = vector.load %arg3[%c0_3, %c0_4] : memref<1x32xf32, #tpu.memory_space<vmem>>, vector<1x32xf32>
    %6 = vector.broadcast %5 : vector<1x32xf32> to vector<8x32xf32>
    %7 = arith.addf %4, %6 : vector<8x32xf32>
    %8 = arith.negf %7 : vector<8x32xf32>
    %9 = math.exp %8 : vector<8x32xf32>
    %cst = arith.constant 1.000000e+00 : f32
    %10 = vector.broadcast %cst : f32 to vector<8x32xf32>
    %11 = arith.addf %10, %9 : vector<8x32xf32>
    %12 = arith.divf %10, %11 : vector<8x32xf32>
    %c0_5 = arith.constant 0 : index
    %c0_6 = arith.constant 0 : index
    %13 = vector.load %arg4[%c0_5, %c0_6] : memref<32x32xf32, #tpu.memory_space<vmem>>, vector<32x32xf32>
    %cst_7 = arith.constant dense<0.000000e+00> : vector<8x32xf32>
    %14 = tpu.matmul %12, %13, %cst_7 {dimension_numbers = #tpu.dot_dimension_numbers<[1], [0], [0], [1], [0, 0, 1, 1], [], []>} : vector<8x32xf32>, vector<32x32xf32>, vector<8x32xf32> -> vector<8x32xf32>
    %c0_8 = arith.constant 0 : index
    %c0_9 = arith.constant 0 : index
    %15 = vector.load %arg5[%c0_8, %c0_9] : memref<1x32xf32, #tpu.memory_space<vmem>>, vector<1x32xf32>
    %16 = vector.broadcast %15 : vector<1x32xf32> to vector<8x32xf32>
    %17 = arith.addf %14, %16 : vector<8x32xf32>
    %18 = arith.negf %17 : vector<8x32xf32>
    %19 = math.exp %18 : vector<8x32xf32>
    %cst_10 = arith.constant 1.000000e+00 : f32
    %20 = vector.broadcast %cst_10 : f32 to vector<8x32xf32>
    %21 = arith.addf %20, %19 : vector<8x32xf32>
    %22 = arith.divf %20, %21 : vector<8x32xf32>
    %c0_11 = arith.constant 0 : index
    %c0_12 = arith.constant 0 : index
    %23 = vector.load %arg6[%c0_11, %c0_12] : memref<32x128xf32, #tpu.memory_space<vmem>>, vector<32x128xf32>
    %cst_13 = arith.constant dense<0.000000e+00> : vector<8x128xf32>
    %24 = tpu.matmul %22, %23, %cst_13 {dimension_numbers = #tpu.dot_dimension_numbers<[1], [0], [0], [1], [0, 0, 1, 1], [], []>} : vector<8x32xf32>, vector<32x128xf32>, vector<8x128xf32> -> vector<8x128xf32>
    %c0_14 = arith.constant 0 : index
    %c0_15 = arith.constant 0 : index
    %25 = vector.load %arg7[%c0_14, %c0_15] : memref<1x128xf32, #tpu.memory_space<vmem>>, vector<1x128xf32>
    %26 = vector.broadcast %25 : vector<1x128xf32> to vector<8x128xf32>
    %27 = arith.addf %24, %26 : vector<8x128xf32>
    %c0_16 = arith.constant 0 : index
    %c0_17 = arith.constant 0 : index
    %28 = vector.load %arg8[%c0_16, %c0_17] : memref<8x128xf32, #tpu.memory_space<vmem>>, vector<8x128xf32>
    tpu.vector_store %arg8[%c0_16, %c0_17], %27 {strides = array<i32>} : memref<8x128xf32, #tpu.memory_space<vmem>>, vector<8x128xf32>,
    return
  }
  func.func @transform_0(%arg0: i32) -> (i32, i32) {
    %c0_i32 = arith.constant 0 : i32
    %c0_i32_0 = arith.constant 0 : i32
    return %arg0, %c0_i32 : i32, i32
  }
  func.func @transform_1(%arg0: i32) -> (i32, i32) {
    %c0_i32 = arith.constant 0 : i32
    %c0_i32_0 = arith.constant 0 : i32
    %c0_i32_1 = arith.constant 0 : i32
    return %c0_i32, %c0_i32_0 : i32, i32
  }
  func.func @transform_2(%arg0: i32) -> (i32, i32) {
    %c0_i32 = arith.constant 0 : i32
    %c0_i32_0 = arith.constant 0 : i32
    %c0_i32_1 = arith.constant 0 : i32
    return %c0_i32, %c0_i32_0 : i32, i32
  }
  func.func @transform_3(%arg0: i32) -> (i32, i32) {
    %c0_i32 = arith.constant 0 : i32
    %c0_i32_0 = arith.constant 0 : i32
    %c0_i32_1 = arith.constant 0 : i32
    return %c0_i32, %c0_i32_0 : i32, i32
  }
  func.func @transform_4(%arg0: i32) -> (i32, i32) {
    %c0_i32 = arith.constant 0 : i32
    %c0_i32_0 = arith.constant 0 : i32
    %c0_i32_1 = arith.constant 0 : i32
    return %c0_i32, %c0_i32_0 : i32, i32
  }
  func.func @transform_5(%arg0: i32) -> (i32, i32) {
    %c0_i32 = arith.constant 0 : i32
    %c0_i32_0 = arith.constant 0 : i32
    %c0_i32_1 = arith.constant 0 : i32
    return %c0_i32, %c0_i32_0 : i32, i32
  }
  func.func @transform_6(%arg0: i32) -> (i32, i32) {
    %c0_i32 = arith.constant 0 : i32
    %c0_i32_0 = arith.constant 0 : i32
    %c0_i32_1 = arith.constant 0 : i32
    return %c0_i32, %c0_i32_0 : i32, i32
  }
  func.func @transform_7(%arg0: i32) -> (i32, i32) {
    %c0_i32 = arith.constant 0 : i32
    %c0_i32_0 = arith.constant 0 : i32
    return %arg0, %c0_i32 : i32, i32
  }
}

</mosaic_0001>

<bundles_post_ra>
// kernel: tpu_custom_call.1
= control target key start
LH: loop header
LB: loop body
LE: loop exit
PB: predicated region body
PF: predicated region fallthrough
CT: control target
= control target key end

     0   :  { %12 = vsyncpa [#allocation3], 0  ;;  %s519_s0 = inlined_call_operand.vmem [shape: f32[8,1], index: 0, kind: input, shape index: {}]   ;;  %s520_s1 = inlined_call_operand.vmem [shape: f32[1,32], index: 1, kind: input, shape index: {}]   ;;  %s521_s2 = inlined_call_operand.vmem [shape: f32[1,32], index: 2, kind: input, shape index: {}]   ;;  %s522_s3 = inlined_call_operand.hbm [shape: f32[32,32], index: 3, kind: input, shape index: {}]   ;;  %s523_s4 = inlined_call_operand.vmem [shape: f32[1,32], index: 4, kind: input, shape index: {}]   ;;  %s524_s5 = inlined_call_operand.hbm [shape: f32[32,128], index: 5, kind: input, shape index: {}]   ;;  %s525_s6 = inlined_call_operand.vmem [shape: f32[1,128], index: 6, kind: input, shape index: {}]   ;;  %s526_s7 = inlined_call_operand.hbm [shape: f32[8,128], index: 7, kind: output, shape index: {}]  }
   0x1   :  { %13 = vsyncpa [#allocation6], 0 }
   0x2   :  { %14 = vsyncpa [#allocation4], 0  ;;  %s417_s24 = smov [#allocation2]   ;;  %s345_s28 = scalar_lea.hbm %s522_s3, 512 }
   0x3   :  { %s26_s25 = sshll.u32 %s417_s24, 4  ;;  %p346_p0 = scmp.ne.s32.totalorder %s522_s3, %s345_s28  ;;  %s27_s25 = int_to_ptr.vmem [resolvable:$true] %s26_s25 }
   0x4   :  { %p349_p1 = scmp.lt.u32.totalorder %s345_s28, %s522_s3 }
   0x6   :  { %p351_p2 = pnand %p349_p1, %p346_p0 }
   0x8   :  { %354 = shalt.err (!%p351_p2)
}
   0x9   :  { %s355_s10 = scalar_lea.vmem %s27_s25, 512  ;;  %p360_p4 = scmp.lt.s32.totalorder %s27_s25, %s27_s25 }
   0xa   :  { %p356_p3 = scmp.ne.s32.totalorder %s27_s25, %s355_s10  ;;  %p361_p5 = scmp.lt.s32.totalorder %s355_s10, %s355_s10 }
   0xc   :  { %p362_p6 = por %p361_p5, %p360_p4 }
   0xe   :  { %p363_p7 = pnand %p362_p6, %p356_p3 }
  0x10   :  { %366 = shalt.err (!%p363_p7)
}
  0x11   :  { %s418_s11 = smov 128   ;;  %s419_s12 = smov 8  }
  0x12   :  { %32 = dma.hbm_to_vmem [thread:$0]  %s522_s3, 512, %s27_s25, [#allocation3], %s418_s11, %s418_s11, %s419_s12  }
  0x13   :  { %s420_s15 = smov [#allocation5]   ;;  %s367_s19 = scalar_lea.hbm %s524_s5, 512 }
  0x14   :  { %s40_s16 = sshll.u32 %s420_s15, 4  ;;  %p368_p8 = scmp.ne.s32.totalorder %s524_s5, %s367_s19  ;;  %s41_s16 = int_to_ptr.vmem [resolvable:$true] %s40_s16 }
  0x15   :  { %p371_p9 = scmp.lt.u32.totalorder %s367_s19, %s524_s5 }
  0x17   :  { %p373_p10 = pnand %p371_p9, %p368_p8 }
  0x19   :  { %376 = shalt.err (!%p373_p10)
}
  0x1a   :  { %s377_s24 = scalar_lea.vmem %s41_s16, 512  ;;  %p382_p12 = scmp.lt.s32.totalorder %s41_s16, %s41_s16 }
  0x1b   :  { %p378_p11 = scmp.ne.s32.totalorder %s41_s16, %s377_s24  ;;  %p383_p13 = scmp.lt.s32.totalorder %s377_s24, %s377_s24 }
  0x1d   :  { %p384_p0 = por %p383_p13, %p382_p12 }
  0x1f   :  { %p385_p1 = pnand %p384_p0, %p378_p11 }
  0x21   :  { %388 = shalt.err (!%p385_p1)
}
  0x22   :  { %46 = dma.hbm_to_vmem [thread:$0]  %s524_s5, 512, %s41_s16, [#allocation6], %s418_s11, %s418_s11, %s419_s12  }
  0x23   :  { %411 = dma.done.wait [#allocation3], 512  }
  0x24   :  { %412 = vsyncadd [#allocation3], 4294966784 }
  0x25   :  { %413 = dma.done.wait [#allocation6], 512  }
  0x26   :  { %414 = vsyncadd [#allocation6], 4294966784  ;;  %v421_v0 = vmov 0   ;;  %v55_v1 = vld [vmem:[%s519_s0] sm:$0xff]  ;;  %v84_v3 = vld [vmem:[#allocation2 + $0x8] sm:$0xff]  ;;  %v422_v5 = vmov 0.0|0.0  }
  0x27   :  { %336 = vset.pattern.permute.xlu0 %v421_v0  ;;  %v83_v2 = vld [vmem:[#allocation2] sm:$0xff]  ;;  %v85_v4 = vld [vmem:[#allocation2 + $0x10] sm:$0xff]  ;;  %315 = vmatprep.subr.bf16.mxu0 %v422_v5  ;;  %v86_v7 = vld [vmem:[#allocation2 + $0x18] sm:$0xff]  ;;  %vm423_vm0 = vmmov 0   ;;  %v424_v8 = vmov 0.0   ;;  %vm94_vm1 = vcmask 261120  }
  0x28   :  { %59 = vperm.xlu0 %336, %v55_v1   ;;  %v316_v6 = vpack.c.bf16 %v84_v3, %v83_v2  ;;  %301 = vmatprep.mubr.msk.f32.mxu0 %vm423_vm0, %v424_v8  ;;  %v319_v9 = vpack.c.bf16 %v86_v7, %v85_v4  ;;  %v275_v10 = vld [vmem:[%s520_s1] ss:$0 sm:$0xff]  ;;  %v175_v20 = vld [vmem:[#allocation5 + $0x8] sm:$0xff]  ;;  %v176_v21 = vld [vmem:[#allocation5 + $0x10] sm:$0xff]  ;;  %s425_s9 = smov [#allocation7]  }
  0x29   :  { %321 = vmatprep.subr.bf16.mxu1 %v422_v5  ;;  %312 = vmatprep.mubr.msk.f32.mxu1 %vm423_vm0, %v424_v8  ;;  %v276_v11 = vld [vmem:[%s521_s2] ss:$0 sm:$0xff]  ;;  %v177_v23 = vld [vmem:[#allocation5 + $0x18] sm:$0xff]  ;;  %s265_s10 = sshll.u32 %s425_s9, 4  ;;  %s266_s10 = int_to_ptr.vmem [resolvable:$true] %s265_s10 }
  0x2a   :  { %317 = vmatpush3.bf16.msra.mxu0 %v316_v6  ;;  %v174_v19 = vld [vmem:[#allocation5] sm:$0xff]  ;;  %v325_v24 = vpack.c.bf16 %v177_v23, %v176_v21  ;;  %p394_p3 = scmp.lt.s32.totalorder %s266_s10, %s266_s10 }
  0x2b   :  { %318 = vmatprep.subr.bf16.mxu0 %v422_v5  ;;  %v322_v22 = vpack.c.bf16 %v175_v20, %v174_v19  ;;  %v278_v25 = vld [vmem:[%s523_s4] ss:$0 sm:$0xff]  ;;  %s389_s4 = scalar_lea.vmem %s266_s10, 128 }
  0x2c   :  { %v281_v33 = vld [vmem:[%s525_s6] ss:$0 sm:$0xff]  ;;  %p390_p2 = scmp.ne.s32.totalorder %s266_s10, %s389_s4  ;;  %p395_p4 = scmp.lt.s32.totalorder %s389_s4, %s389_s4 }
  0x2d   :  { %323 = vmatpush3.bf16.msra.mxu1 %v322_v22 }
  0x2e   :  { %320 = vmatpush3.bf16.msra.mxu0 %v319_v9  ;;  %324 = vmatprep.subr.bf16.mxu1 %v422_v5  ;;  %p396_p5 = por %p395_p4, %p394_p3 }
  0x30   :  { %p397_p6 = pnand %p396_p5, %p390_p2 }
  0x31   :  { %326 = vmatpush3.bf16.msra.mxu1 %v325_v24 }
  0xa7   :  { %v60_v12 = vpop.permute.xlu0 %59 }
  0xa8   :  { %v68_v13 = vmul.f32 %v275_v10, %v60_v12 }
  0xaa   :  { %v76_v14 = vadd.f32 %v276_v11, %v68_v13 }
  0xac   :  { %v277_v15 = vmul.f32 -1.442695, %v76_v14 }
  0xae   :  { %337 = vpow2.f32 %v277_v15 }
  0xb8   :  { %v338_v16 = vpop.eup %337 }
  0xb9   :  { %v80_v17 = vadd.f32 1.0, %v338_v16 }
  0xbb   :  { %339 = vrcp.f32 %v80_v17 }
  0xc5   :  { %v340_v18 = vpop.eup %339 }
  0xc6   :  { %302 = vmatmul.mubr.msk.f32.vlgmr.msra.gmra.mrb[0].mxu0 %vm94_vm1, %v340_v18 }
 0x199   :  { %v164_v26 = vpop.f32.mrb[0].mxu0 }
 0x19a   :  { %v165_v27 = vadd.f32 %v278_v25, %v164_v26  ;;  %v303_v28 = vpop.f32.mrb[1].mxu0 }
 0x19c   :  { %v280_v29 = vmul.f32 -1.442695, %v165_v27 }
 0x19e   :  { %341 = vpow2.f32 %v280_v29 }
 0x1a8   :  { %v342_v30 = vpop.eup %341 }
 0x1a9   :  { %v171_v31 = vadd.f32 1.0, %v342_v30 }
 0x1ab   :  { %343 = vrcp.f32 %v171_v31 }
 0x1b5   :  { %v344_v32 = vpop.eup %343 }
 0x1b6   :  { %313 = vmatmul.mubr.msk.f32.vlgmr.msra.gmra.mrb[0].mxu1 %vm94_vm1, %v344_v32 }
 0x289   :  { %v254_v34 = vpop.f32.mrb[0].mxu1 }
 0x28a   :  { %v255_v35 = vadd.f32 %v281_v33, %v254_v34  ;;  %v314_v36 = vpop.f32.mrb[1].mxu1 }
 0x28c   :  { %258 = vst [vmem:[#allocation7] sm:$0xff] %v255_v35 }
 0x28d   :  { %400 = shalt.err (!%p397_p6)
}
 0x28e   :  { %s401_s13 = scalar_lea.hbm %s526_s7, 128 }
 0x28f   :  { %p402_p7 = scmp.ne.s32.totalorder %s526_s7, %s401_s13  ;;  %p405_p8 = scmp.lt.u32.totalorder %s401_s13, %s526_s7 }
 0x291   :  { %p407_p9 = pnand %p405_p8, %p402_p7 }
 0x293   :  { %410 = shalt.err (!%p407_p9)
}
 0x294   :  { %268 = dma.vmem_to_hbm [thread:$0]  %s266_s10, 128, %s526_s7, [#allocation4]  }
 0x295   :  { %415 = dma.done.wait [#allocation4], 128  }
 0x296   :  { %416 = vsyncadd [#allocation4], 4294967168 }
 0x297   :  { %272 = vsyncpa [#allocation3], 1 }
 0x298   :  { %273 = vsyncpa [#allocation6], 1 }
 0x299   :  { %274 = vsyncpa [#allocation4], 1 }

</bundles_post_ra>
